<compile_context>
chip_gen: v6e
topology: v6e:2x2x1
jax: 0.10.0
libtpu: 0.0.40
codegen_flags: <defaults>
</compile_context>

<pallas_src>
import functools

import numpy as np
import jax
import jax.numpy as jnp
from jax import lax
from jax.experimental import pallas as pl
from jax.experimental.pallas import tpu as pltpu


# --------------------------------------------------------------------------------------
# Kernel
# --------------------------------------------------------------------------------------
def _nse_sums_kernel(grp_ref, cs_ref, yT_ref, yP_ref, out_ref, *,
                     log_opt: bool, g: int, chunk: int, spin_up: int, l_total: int,
                     blocks_per_split: int, unroll: bool):
    """Streaming masked-moment accumulation over the (packed) time axis of one tile.

    out rows (revisited (K, TN) block, accumulated over the last grid axis):
      0: M   = sum m                       m = in-range & ~isnan(yTrue)
      1: S1  = sum m*(yT - c)              c  = per-station shift (row 0 of cs_ref)
      2: S2  = sum m*(yT - c)^2
      3: Sd  = sum m*(yP - yT)^2
      (log branch)
      4: Mlog  = sum mlog                  mlog = in-range & ~isnan(log10(sqrt(yT)+0.1))
      5: SL1m  = sum mlog*(yTlog - cL)     cL = per-station log shift (row 1 of cs_ref)
      6: SL1   = sum m*(yTlog - cL)        (NaN leaks when yT < 0, as in torch)
      7: SL2   = sum m*(yTlog - cL)^2
      8: SdL   = sum m*(yPlog - yTlog)^2
    """
    tl, tn = yT_ref.shape
    k = out_ref.shape[0]
    l = pl.program_id(2)
    # Unclamped global time-block index (the index_map clamps for DMA safety; masking here
    # uses the *unclamped* index so duplicated/overhanging blocks contribute exactly zero).
    tb = pl.program_id(0) * blocks_per_split + l
    row_base = tb * tl

    @pl.when(l == 0)
    def _init():
        out_ref[...] = jnp.zeros_like(out_ref)

    grp = grp_ref[...]                                   # (1, tn) int32: lane group / sentinel
    c0 = cs_ref[0:1, :]                                  # (1, tn) f32  : per-lane shift
    cL = cs_ref[1:2, :]                                  # (1, tn) f32  : per-lane log shift

    # Loop-invariant pieces (hoisted: JAX does not CSE broadcast_in_dim inside loops).
    base_iota = lax.broadcasted_iota(jnp.int32, (chunk, tn), 0)
    t_lane = base_iota * g + grp                         # original-time offset per element
    n_chunks = tl // chunk

    def body(i, accs):
        r0 = pl.multiple_of(i * chunk, chunk)
        yT = yT_ref[pl.ds(r0, chunk), :].astype(jnp.float32)
        yP = yP_ref[pl.ds(r0, chunk), :].astype(jnp.float32)

        # Original time index of every element; pad lanes carry a >= l_total sentinel group.
        t = t_lane + (row_base + r0) * g
        in_rng = jnp.logical_and(t >= spin_up, t < l_total)
        obs_ok = jnp.logical_and(in_rng, jnp.logical_not(jnp.isnan(yT)))

        yTs = yT - c0
        d = yP - yT
        parts = [
            obs_ok.astype(jnp.float32),
            jnp.where(obs_ok, yTs, 0.0),
            jnp.where(obs_ok, yTs * yTs, 0.0),
            jnp.where(obs_ok, d * d, 0.0),
        ]
        if log_opt:
            # sqrt/log10 computed exactly once per element, kept in vregs (EUP work).
            yTL = jnp.log10(jnp.sqrt(yT) + 0.1)
            yPL = jnp.log10(jnp.sqrt(yP) + 0.1)
            log_ok = jnp.logical_and(in_rng, jnp.logical_not(jnp.isnan(yTL)))
            yTLs = yTL - cL
            dL = yPL - yTL
            parts += [
                log_ok.astype(jnp.float32),
                jnp.where(log_ok, yTLs, 0.0),
                jnp.where(obs_ok, yTLs, 0.0),          # NaN leak when yT < 0 (torch semantics)
                jnp.where(obs_ok, yTLs * yTLs, 0.0),
                jnp.where(obs_ok, dL * dL, 0.0),
            ]
        return tuple(a + p_.sum(axis=0, keepdims=True) for a, p_ in zip(accs, parts))

    init = tuple(jnp.zeros((1, tn), jnp.float32) for _ in range(k))
    accs = lax.fori_loop(0, n_chunks, body, init, unroll=unroll)

    # One small (1, TN) read-modify-write per row per grid step (no concatenate / XLU pack).
    for i in range(k):
        out_ref[i:i + 1, :] += accs[i]


# --------------------------------------------------------------------------------------
# Wrapper
# --------------------------------------------------------------------------------------
def nse_loss(yTrue, yPred, spin_up: int, *,
             log_loss_opt: bool = False, w_log: float = 0.25, w_station=None,
             block_rows: int = 2048, block_lanes: int = 256,
             shift_sample_rows: int = 365, cast_to_bf16: bool = False,
             interpret: bool = False):
    """Forward pass of nseLoss: returns 1 - NSE (scalar).  Accepts f32 or bf16 inputs.

    cast_to_bf16=True halves HBM traffic (accumulation stays f32) but changes results at the
    ~1e-3 relative level — off by default.
    """
    yTrue = jnp.asarray(yTrue)
    yPred = jnp.asarray(yPred)
    L0, N = int(yTrue.shape[0]), int(yTrue.shape[1])
    spin_up = int(spin_up)
    L_eff = L0 - spin_up
    if L_eff <= 0:
        raise ValueError("spin_up must be smaller than the sequence length")

    if cast_to_bf16 and yTrue.dtype == jnp.float32:
        yTrue = yTrue.astype(jnp.bfloat16)
        yPred = yPred.astype(jnp.bfloat16)

    if w_station is None:
        w = jnp.ones((N,), jnp.float32)
    else:
        w = jnp.asarray(w_station, jnp.float32).reshape(N)

    # ---- per-station shifts for well-conditioned one-pass moments (tiny sample slice) ----
    ns = min(L_eff, int(shift_sample_rows))
    sample = yTrue[spin_up:spin_up + ns].astype(jnp.float32)
    c_sta = jnp.nan_to_num(jnp.nanmean(sample, axis=0), nan=0.0, posinf=0.0, neginf=0.0)
    if log_loss_opt:
        cL_sta = jnp.nan_to_num(jnp.nanmean(jnp.log10(jnp.sqrt(sample) + 0.1), axis=0),
                                nan=0.0, posinf=0.0, neginf=0.0)
    else:
        cL_sta = jnp.zeros((N,), jnp.float32)

    # ---- lane packing for narrow N via a *free* reshape (g must divide L0: zero copies) ----
    if N >= 128:
        g = 1
    else:
        g = 1
        for cand in range(min(128 // N, L0), 0, -1):
            if L0 % cand == 0:
                g = cand
                break
    W = g * N
    Lg = L0 // g
    yT2 = yTrue.reshape(Lg, W)
    yP2 = yPred.reshape(Lg, W)

    # ---- lane tiling ----
    if W < 128:
        TN = W                                           # full-dim block (always legal)
    else:
        TN = min(max(128, (int(block_lanes) // 128) * 128), 128 * (W // 128))
    J = -(-W // TN)                                      # station tiles
    Wp = J * TN                                          # padded metadata / output width
    lane_tiles = -(-TN // 128)

    # ---- time tiling / in-kernel chunking ----
    itemsize = jnp.dtype(yT2.dtype).itemsize
    if Lg <= 8:
        chunk = Lg
        TL = Lg
    else:
        chunk = max(8, 8 * max(1, 4 // lane_tiles))      # keep per-chunk values ~4 vregs
        TL = max(chunk, (min(int(block_rows), Lg + chunk - 1) // chunk) * chunk)
        max_block_bytes = 4 * 1024 * 1024                # per-input block cap (v7x safe)
        while TL > chunk and TL * TN * itemsize > max_block_bytes:
            TL = max(chunk, ((TL // 2) // chunk) * chunk)
    Lb = -(-Lg // TL)                                    # total time blocks

    # ---- v7x megacore: split time in two when there is only one station tile ----
    P = 2 if (J == 1 and Lb >= 2) else 1
    bps = -(-Lb // P)                                    # blocks per split

    # ---- tiny per-lane metadata (group index / sentinel, and the two shifts) ----
    grp_np = np.full((Wp,), L0, dtype=np.int32)          # sentinel => always masked
    grp_np[:W] = np.repeat(np.arange(g, dtype=np.int32), N)
    grp_meta = jnp.asarray(grp_np).reshape(1, Wp)

    cs = jnp.zeros((2, Wp), jnp.float32)
    cs = cs.at[0, :W].set(jnp.tile(c_sta, g))
    cs = cs.at[1, :W].set(jnp.tile(cL_sta, g))

    K = 9 if log_loss_opt else 4
    grid = (P, J, bps)
    lb_max = Lb - 1

    def t_map(p, j, l):
        # Clamp so the DMA window always starts in-bounds; masking uses the unclamped index.
        return (jnp.minimum(p * bps + l, lb_max), j)

    kernel = functools.partial(
        _nse_sums_kernel, log_opt=bool(log_loss_opt), g=g, chunk=chunk,
        spin_up=spin_up, l_total=L0, blocks_per_split=bps,
        unroll=(TL // chunk) <= 8)

    elems = L0 * N
    cost = pl.CostEstimate(
        flops=int((34 if log_loss_opt else 14) * elems),
        transcendentals=int(4 * elems) if log_loss_opt else 0,
        bytes_accessed=int(2 * elems * itemsize + P * K * Wp * 4 + 3 * Wp * 4),
    )

    in_block_bytes = TL * TN * itemsize
    vmem_need = 4 * in_block_bytes + 4 * (K + 3) * TN * 4 + (2 << 20)
    vmem_limit = int(min(64 * 1024 * 1024, max(32 * 1024 * 1024, 2 * vmem_need)))

    sums = pl.pallas_call(
        kernel,
        out_shape=jax.ShapeDtypeStruct((P, K, Wp), jnp.float32),
        grid=grid,
        in_specs=[
            pl.BlockSpec((1, TN), lambda p, j, l: (0, j)),     # lane group metadata
            pl.BlockSpec((2, TN), lambda p, j, l: (0, j)),     # per-lane shifts (c, cL)
            pl.BlockSpec((TL, TN), t_map),                     # yTrue (packed view)
            pl.BlockSpec((TL, TN), t_map),                     # yPred (packed view)
        ],
        out_specs=pl.BlockSpec((None, K, TN), lambda p, j, l: (p, 0, j)),
        compiler_params=pltpu.CompilerParams(
            dimension_semantics=("parallel", "parallel", "arbitrary"),
            vmem_limit_bytes=vmem_limit,
        ),
        cost_estimate=cost,
        interpret=interpret,
    )(grp_meta, cs, yT2, yP2)

    # ---- finalize: fold parallel splits + lane groups, then per-station NSE (tiny XLA) ----
    sums = sums.sum(axis=0)                              # (K, Wp)
    sums = sums[:, :W].reshape(K, g, N).sum(axis=1)      # (K, N)

    M, S1, S2, Sd = sums[0], sums[1], sums[2], sums[3]
    L_f = jnp.float32(L_eff)
    valid = (L_f - M) / L_f < (1.0 / 5.0)                # torch index_select criterion

    delta = S1 / M                                       # nanmean(yT) - c
    den = S2 - S1 * delta                                # = sum m*(yT - mean)^2, shift-exact
    nse_per = 1.0 - Sd / den

    w_sel = jnp.where(valid, w, 0.0)
    w_sum = w_sel.sum()
    nse = jnp.where(valid, nse_per * w_sel, 0.0).sum() / w_sum

    if log_loss_opt:
        Mlog, SL1m, SL1, SL2, SdL = sums[4], sums[5], sums[6], sums[7], sums[8]
        dLm = SL1m / Mlog                                # nanmean(yTlog) - cL
        denL = SL2 - 2.0 * dLm * SL1 + dLm * dLm * M
        nseL_per = 1.0 - SdL / denL
        nseL = jnp.where(valid, nseL_per * w_sel, 0.0).sum() / w_sum
        nse = nse * (1.0 - float(w_log)) + nseL * float(w_log)

    return 1.0 - nse


# --------------------------------------------------------------------------------------
# Pure numpy reference (direct transcription of the PyTorch module, with real index_select)
# --------------------------------------------------------------------------------------
def _reference_numpy(yTrue, yPred, spin_up, log_opt=False, w_log=0.25):
    yT = np.asarray(yTrue, np.float64)[spin_up:]
    yP = np.asarray(yPred, np.float64)[spin_up:]
    L, N = yT.shape
    w = np.ones(N)
    idx = [i for i in range(N) if np.isnan(yT[:, i]).sum() / L < 1.0 / 5.0]
    yT, yP, w = yT[:, idx], yP[:, idx], w[idx]
    mean = np.nanmean(yT, axis=0, keepdims=True)
    mask = np.where(np.isnan(yT), 0.0, 1.0)
    pad = np.where(np.isnan(yT), 0.0, yT)
    nse_t = 1 - ((yP - pad) ** 2 * mask).sum(0, keepdims=True) \
              / ((pad - mean) ** 2 * mask).sum(0, keepdims=True)
    nse = (nse_t * w).sum() / w.sum()
    if log_opt:
        yTL = np.log10(np.sqrt(yT) + 0.1)
        yPL = np.log10(np.sqrt(yP) + 0.1)
        meanL = np.nanmean(yTL, axis=0, keepdims=True)
        padL = np.where(np.isnan(yT), 0.0, yTL)
        nse_lt = 1 - ((yPL - padL) ** 2 * mask).sum(0, keepdims=True) \
                   / ((padL - meanL) ** 2 * mask).sum(0, keepdims=True)
        nseL = (nse_lt * w).sum() / w.sum()
        nse = nse * (1 - w_log) + nseL * w_log
    return 1.0 - nse


# --------------------------------------------------------------------------------------
# Tests
# --------------------------------------------------------------------------------------
def _check(name, loss, ref, tol=2e-4):
    loss = float(loss)
    ref = float(ref)
    assert np.isfinite(loss), f"{name}: kernel produced non-finite loss"
    assert np.allclose(loss, ref, rtol=tol, atol=tol), f"{name}: kernel={loss} ref={ref}"


if __name__ == "__main__":
    key = jax.random.PRNGKey(0)
    keys = jax.random.split(key, 8)

    # ---- test 1: tiny, narrow N (lane packing g=16, single grid step) ----
    L, N, spin = 64, 8, 8
    yT1 = jax.random.uniform(keys[0], (L, N), jnp.float32, minval=0.5, maxval=5.0)
    yP1 = jnp.abs(yT1 + 0.3 * jax.random.normal(keys[1], (L, N), jnp.float32))
    yT1 = yT1.at[spin + 5:spin + 30, 3].set(jnp.nan)      # invalid station (>20% NaN)
    yT1 = yT1.at[spin + 2:spin + 6, 0].set(jnp.nan)
    yT1 = yT1.at[spin + 10:spin + 13, 5].set(jnp.nan)
    for log_opt in (False, True):
        out = jax.block_until_ready(nse_loss(yT1, yP1, spin, log_loss_opt=log_opt))
        _check(f"test1 log={log_opt}", out, _reference_numpy(yT1, yP1, spin, log_opt))

    # ---- test 2: narrow N, long L -> single station tile, P=2 time split + clamped blocks ----
    L2, N2, spin2 = 4112, 8, 16
    yT2 = jax.random.uniform(keys[2], (L2, N2), jnp.float32, minval=0.5, maxval=5.0)
    yP2 = jnp.abs(yT2 + 0.3 * jax.random.normal(keys[3], (L2, N2), jnp.float32))
    yT2 = yT2.at[spin2 + 10:spin2 + 960, 3].set(jnp.nan)  # invalid station
    yT2 = yT2.at[spin2 + 2:spin2 + 52, 0].set(jnp.nan)
    yT2 = yT2.at[spin2 + 100:spin2 + 112, 6].set(jnp.nan)
    out2 = jax.block_until_ready(
        nse_loss(yT2, yP2, spin2, log_loss_opt=True, block_rows=64))
    _check("test2", out2, _reference_numpy(yT2, yP2, spin2, log_opt=True))

    # ---- test 3: wide N -> 2 station tiles (TN=256, partial lane block), log path ----
    L3, N3, spin3 = 520, 300, 20
    yT3 = jax.random.uniform(keys[4], (L3, N3), jnp.float32, minval=0.5, maxval=5.0)
    yP3 = jnp.abs(yT3 + 0.3 * jax.random.normal(keys[5], (L3, N3), jnp.float32))
    yT3 = yT3.at[spin3 + 5:spin3 + 160, 17].set(jnp.nan)  # invalid station
    yT3 = yT3.at[spin3 + 5:spin3 + 35, 3].set(jnp.nan)
    yT3 = yT3.at[spin3 + 50:spin3 + 62, 250].set(jnp.nan)
    out3 = jax.block_until_ready(
        nse_loss(yT3, yP3, spin3, log_loss_opt=True, block_rows=128, block_lanes=256))
    _check("test3", out3, _reference_numpy(yT3, yP3, spin3, log_opt=True))

    # ---- test 4: prime L (no lane packing possible, W=8 < 128 full-dim lane block) ----
    L4, N4, spin4 = 67, 8, 5
    yT4 = jax.random.uniform(keys[6], (L4, N4), jnp.float32, minval=0.5, maxval=5.0)
    yP4 = jnp.abs(yT4 + 0.3 * jax.random.normal(keys[7], (L4, N4), jnp.float32))
    yT4 = yT4.at[spin4 + 3:spin4 + 23, 2].set(jnp.nan)    # invalid station
    yT4 = yT4.at[spin4 + 1:spin4 + 4, 0].set(jnp.nan)
    out4 = jax.block_until_ready(nse_loss(yT4, yP4, spin4, log_loss_opt=True))
    _check("test4", out4, _reference_numpy(yT4, yP4, spin4, log_opt=True))

    # ---- test 5: same data as test 3 but larger time tile -> non-unrolled chunk loop ----
    out5 = jax.block_until_ready(
        nse_loss(yT3, yP3, spin3, log_loss_opt=True, block_rows=384, block_lanes=256))
    _check("test5", out5, _reference_numpy(yT3, yP3, spin3, log_opt=True))

    print("KERNEL_OK")
</pallas_src>

<mosaic_0001>
module attributes {stable_mosaic.version = 11 : i64} {
  func.func @_nse_sums_kernel(%arg0: i32, %arg1: i32, %arg2: i32, %arg3: memref<1x128xi32, #tpu.memory_space<vmem>>, %arg4: memref<2x128xf32, #tpu.memory_space<vmem>>, %arg5: memref<4x128xf32, #tpu.memory_space<vmem>>, %arg6: memref<4x128xf32, #tpu.memory_space<vmem>>, %arg7: memref<1x4x128xf32, #tpu.memory_space<vmem>>) attributes {dimension_semantics = [#tpu.dimension_semantics<parallel>, #tpu.dimension_semantics<parallel>, #tpu.dimension_semantics<arbitrary>], iteration_bounds = array<i64: 1, 1, 1>, scalar_prefetch = 0 : i64, scratch_operands = 0 : i64, tpu.core_type = #tpu.core_type<tc>, window_params = [{transform_indices = @transform_0, window_bounds = array<i64: 1, 128>}, {transform_indices = @transform_1, window_bounds = array<i64: 2, 128>}, {transform_indices = @transform_2, window_bounds = array<i64: 4, 128>}, {transform_indices = @transform_3, window_bounds = array<i64: 4, 128>}, {transform_indices = @transform_4, window_bounds = array<i64: 1, 4, 128>}]} {
    %c1_i32 = arith.constant 1 : i32
    %0 = arith.muli %arg0, %c1_i32 : i32
    %1 = arith.addi %0, %arg2 : i32
    %c4_i32 = arith.constant 4 : i32
    %2 = arith.muli %1, %c4_i32 : i32
    %c0_i32 = arith.constant 0 : i32
    %3 = arith.cmpi eq, %arg2, %c0_i32 : i32
    %4 = arith.extui %3 : i1 to i32
    %c0_i32_0 = arith.constant 0 : i32
    %5 = arith.cmpi ne, %4, %c0_i32_0 : i32
    scf.if %5 {
      %cst_42 = arith.constant 0.000000e+00 : f32
      %84 = vector.broadcast %cst_42 : f32 to vector<4x128xf32>
      %c0_43 = arith.constant 0 : index
      %c0_44 = arith.constant 0 : index
      %c0_45 = arith.constant 0 : index
      %85 = vector.load %arg7[%c0_43, %c0_44, %c0_45] : memref<1x4x128xf32, #tpu.memory_space<vmem>>, vector<1x4x128xf32>
      %86 = vector.shape_cast %85 : vector<1x4x128xf32> to vector<4x128xf32>
      %87 = vector.shape_cast %84 : vector<4x128xf32> to vector<1x4x128xf32>
      tpu.vector_store %arg7[%c0_43, %c0_44, %c0_45], %87 {strides = array<i32>} : memref<1x4x128xf32, #tpu.memory_space<vmem>>, vector<1x4x128xf32>,
    } else {
    }
    %c0 = arith.constant 0 : index
    %c0_1 = arith.constant 0 : index
    %6 = vector.load %arg3[%c0, %c0_1] : memref<1x128xi32, #tpu.memory_space<vmem>>, vector<1x128xi32>
    %c0_2 = arith.constant 0 : index
    %c0_3 = arith.constant 0 : index
    %7 = vector.load %arg4[%c0_2, %c0_3] : memref<2x128xf32, #tpu.memory_space<vmem>>, vector<1x128xf32>
    %8 = tpu.iota {dimensions = array<i32: 0>} : vector<4x128xi32>
    %c16_i32 = arith.constant 16 : i32
    %9 = vector.broadcast %c16_i32 : i32 to vector<4x128xi32>
    %10 = arith.muli %8, %9 : vector<4x128xi32>
    %11 = vector.broadcast %6 : vector<1x128xi32> to vector<4x128xi32>
    %12 = arith.addi %10, %11 : vector<4x128xi32>
    %cst = arith.constant 0.000000e+00 : f32
    %13 = vector.broadcast %cst : f32 to vector<1x128xf32>
    %cst_4 = arith.constant 0.000000e+00 : f32
    %14 = vector.broadcast %cst_4 : f32 to vector<1x128xf32>
    %cst_5 = arith.constant 0.000000e+00 : f32
    %15 = vector.broadcast %cst_5 : f32 to vector<1x128xf32>
    %cst_6 = arith.constant 0.000000e+00 : f32
    %16 = vector.broadcast %cst_6 : f32 to vector<1x128xf32>
    %c0_i32_7 = arith.constant 0 : i32
    %c4_i32_8 = arith.constant 4 : i32
    %17 = arith.muli %c0_i32_7, %c4_i32_8 : i32
    %18 = tpu.assume_multiple %17, 4 : i32
    %19 = arith.index_cast %18 : i32 to index
    %c0_9 = arith.constant 0 : index
    %20 = vector.load %arg5[%19, %c0_9] : memref<4x128xf32, #tpu.memory_space<vmem>>, vector<4x128xf32>
    %21 = arith.index_cast %18 : i32 to index
    %c0_10 = arith.constant 0 : index
    %22 = vector.load %arg6[%21, %c0_10] : memref<4x128xf32, #tpu.memory_space<vmem>>, vector<4x128xf32>
    %23 = arith.addi %2, %18 : i32
    %c16_i32_11 = arith.constant 16 : i32
    %24 = arith.muli %23, %c16_i32_11 : i32
    %25 = vector.broadcast %24 : i32 to vector<4x128xi32>
    %26 = arith.addi %12, %25 : vector<4x128xi32>
    %c8_i32 = arith.constant 8 : i32
    %27 = vector.broadcast %c8_i32 : i32 to vector<4x128xi32>
    %28 = arith.cmpi sge, %26, %27 : vector<4x128xi32>
    %c64_i32 = arith.constant 64 : i32
    %29 = vector.broadcast %c64_i32 : i32 to vector<4x128xi32>
    %30 = arith.cmpi slt, %26, %29 : vector<4x128xi32>
    %31 = arith.andi %28, %30 : vector<4x128xi1>
    %32 = arith.cmpf one, %20, %20 : vector<4x128xf32>
    %cst_12 = arith.constant dense<true> : vector<4x128xi1>
    %33 = arith.xori %32, %cst_12 : vector<4x128xi1>
    %34 = arith.andi %31, %33 : vector<4x128xi1>
    %35 = vector.broadcast %7 : vector<1x128xf32> to vector<4x128xf32>
    %36 = arith.subf %20, %35 : vector<4x128xf32>
    %37 = arith.subf %22, %20 : vector<4x128xf32>
    %38 = arith.extui %34 : vector<4x128xi1> to vector<4x128xi32>
    %39 = arith.sitofp %38 : vector<4x128xi32> to vector<4x128xf32>
    %cst_13 = arith.constant 0.000000e+00 : f32
    %40 = vector.broadcast %cst_13 : f32 to vector<4x128xf32>
    %41 = arith.select %34, %36, %40 : vector<4x128xi1>, vector<4x128xf32>
    %42 = arith.mulf %36, %36 : vector<4x128xf32>
    %cst_14 = arith.constant 0.000000e+00 : f32
    %43 = vector.broadcast %cst_14 : f32 to vector<4x128xf32>
    %44 = arith.select %34, %42, %43 : vector<4x128xi1>, vector<4x128xf32>
    %45 = arith.mulf %37, %37 : vector<4x128xf32>
    %cst_15 = arith.constant 0.000000e+00 : f32
    %46 = vector.broadcast %cst_15 : f32 to vector<4x128xf32>
    %47 = arith.select %34, %45, %46 : vector<4x128xi1>, vector<4x128xf32>
    %cst_16 = arith.constant dense<0.000000e+00> : vector<128xf32>
    %48 = vector.multi_reduction <add>, %39, %cst_16 [0] : vector<4x128xf32> to vector<128xf32>
    %49 = vector.shape_cast %48 : vector<128xf32> to vector<1x128xf32>
    %50 = arith.addf %13, %49 : vector<1x128xf32>
    %cst_17 = arith.constant dense<0.000000e+00> : vector<128xf32>
    %51 = vector.multi_reduction <add>, %41, %cst_17 [0] : vector<4x128xf32> to vector<128xf32>
    %52 = vector.shape_cast %51 : vector<128xf32> to vector<1x128xf32>
    %53 = arith.addf %14, %52 : vector<1x128xf32>
    %cst_18 = arith.constant dense<0.000000e+00> : vector<128xf32>
    %54 = vector.multi_reduction <add>, %44, %cst_18 [0] : vector<4x128xf32> to vector<128xf32>
    %55 = vector.shape_cast %54 : vector<128xf32> to vector<1x128xf32>
    %56 = arith.addf %15, %55 : vector<1x128xf32>
    %cst_19 = arith.constant dense<0.000000e+00> : vector<128xf32>
    %57 = vector.multi_reduction <add>, %47, %cst_19 [0] : vector<4x128xf32> to vector<128xf32>
    %58 = vector.shape_cast %57 : vector<128xf32> to vector<1x128xf32>
    %59 = arith.addf %16, %58 : vector<1x128xf32>
    %c1_i32_20 = arith.constant 1 : i32
    %c0_21 = arith.constant 0 : index
    %c0_22 = arith.constant 0 : index
    %c0_23 = arith.constant 0 : index
    %60 = vector.load %arg7[%c0_21, %c0_22, %c0_23] : memref<1x4x128xf32, #tpu.memory_space<vmem>>, vector<1x1x128xf32>
    %61 = vector.shape_cast %60 : vector<1x1x128xf32> to vector<1x128xf32>
    %62 = arith.addf %61, %50 : vector<1x128xf32>
    %c0_24 = arith.constant 0 : index
    %c0_25 = arith.constant 0 : index
    %c0_26 = arith.constant 0 : index
    %63 = vector.load %arg7[%c0_24, %c0_25, %c0_26] : memref<1x4x128xf32, #tpu.memory_space<vmem>>, vector<1x1x128xf32>
    %64 = vector.shape_cast %63 : vector<1x1x128xf32> to vector<1x128xf32>
    %65 = vector.shape_cast %62 : vector<1x128xf32> to vector<1x1x128xf32>
    tpu.vector_store %arg7[%c0_24, %c0_25, %c0_26], %65 {strides = array<i32>} : memref<1x4x128xf32, #tpu.memory_space<vmem>>, vector<1x1x128xf32>,
    %c0_27 = arith.constant 0 : index
    %c1 = arith.constant 1 : index
    %c0_28 = arith.constant 0 : index
    %66 = vector.load %arg7[%c0_27, %c1, %c0_28] : memref<1x4x128xf32, #tpu.memory_space<vmem>>, vector<1x1x128xf32>
    %67 = vector.shape_cast %66 : vector<1x1x128xf32> to vector<1x128xf32>
    %68 = arith.addf %67, %53 : vector<1x128xf32>
    %c0_29 = arith.constant 0 : index
    %c1_30 = arith.constant 1 : index
    %c0_31 = arith.constant 0 : index
    %69 = vector.load %arg7[%c0_29, %c1_30, %c0_31] : memref<1x4x128xf32, #tpu.memory_space<vmem>>, vector<1x1x128xf32>
    %70 = vector.shape_cast %69 : vector<1x1x128xf32> to vector<1x128xf32>
    %71 = vector.shape_cast %68 : vector<1x128xf32> to vector<1x1x128xf32>
    tpu.vector_store %arg7[%c0_29, %c1_30, %c0_31], %71 {strides = array<i32>} : memref<1x4x128xf32, #tpu.memory_space<vmem>>, vector<1x1x128xf32>,
    %c0_32 = arith.constant 0 : index
    %c2 = arith.constant 2 : index
    %c0_33 = arith.constant 0 : index
    %72 = vector.load %arg7[%c0_32, %c2, %c0_33] : memref<1x4x128xf32, #tpu.memory_space<vmem>>, vector<1x1x128xf32>
    %73 = vector.shape_cast %72 : vector<1x1x128xf32> to vector<1x128xf32>
    %74 = arith.addf %73, %56 : vector<1x128xf32>
    %c0_34 = arith.constant 0 : index
    %c2_35 = arith.constant 2 : index
    %c0_36 = arith.constant 0 : index
    %75 = vector.load %arg7[%c0_34, %c2_35, %c0_36] : memref<1x4x128xf32, #tpu.memory_space<vmem>>, vector<1x1x128xf32>
    %76 = vector.shape_cast %75 : vector<1x1x128xf32> to vector<1x128xf32>
    %77 = vector.shape_cast %74 : vector<1x128xf32> to vector<1x1x128xf32>
    tpu.vector_store %arg7[%c0_34, %c2_35, %c0_36], %77 {strides = array<i32>} : memref<1x4x128xf32, #tpu.memory_space<vmem>>, vector<1x1x128xf32>,
    %c0_37 = arith.constant 0 : index
    %c3 = arith.constant 3 : index
    %c0_38 = arith.constant 0 : index
    %78 = vector.load %arg7[%c0_37, %c3, %c0_38] : memref<1x4x128xf32, #tpu.memory_space<vmem>>, vector<1x1x128xf32>
    %79 = vector.shape_cast %78 : vector<1x1x128xf32> to vector<1x128xf32>
    %80 = arith.addf %79, %59 : vector<1x128xf32>
    %c0_39 = arith.constant 0 : index
    %c3_40 = arith.constant 3 : index
    %c0_41 = arith.constant 0 : index
    %81 = vector.load %arg7[%c0_39, %c3_40, %c0_41] : memref<1x4x128xf32, #tpu.memory_space<vmem>>, vector<1x1x128xf32>
    %82 = vector.shape_cast %81 : vector<1x1x128xf32> to vector<1x128xf32>
    %83 = vector.shape_cast %80 : vector<1x128xf32> to vector<1x1x128xf32>
    tpu.vector_store %arg7[%c0_39, %c3_40, %c0_41], %83 {strides = array<i32>} : memref<1x4x128xf32, #tpu.memory_space<vmem>>, vector<1x1x128xf32>,
    return
  }
  func.func @transform_0(%arg0: i32, %arg1: i32, %arg2: i32) -> (i32, i32) {
    %c0_i32 = arith.constant 0 : i32
    %c0_i32_0 = arith.constant 0 : i32
    return %c0_i32, %arg1 : i32, i32
  }
  func.func @transform_1(%arg0: i32, %arg1: i32, %arg2: i32) -> (i32, i32) {
    %c0_i32 = arith.constant 0 : i32
    %c0_i32_0 = arith.constant 0 : i32
    return %c0_i32, %arg1 : i32, i32
  }
  func.func @transform_2(%arg0: i32, %arg1: i32, %arg2: i32) -> (i32, i32) {
    %c1_i32 = arith.constant 1 : i32
    %0 = arith.muli %arg0, %c1_i32 : i32
    %1 = arith.addi %0, %arg2 : i32
    %c0_i32 = arith.constant 0 : i32
    %2 = arith.minsi %1, %c0_i32 : i32
    %c0_i32_0 = arith.constant 0 : i32
    return %2, %arg1 : i32, i32
  }
  func.func @transform_3(%arg0: i32, %arg1: i32, %arg2: i32) -> (i32, i32) {
    %c1_i32 = arith.constant 1 : i32
    %0 = arith.muli %arg0, %c1_i32 : i32
    %1 = arith.addi %0, %arg2 : i32
    %c0_i32 = arith.constant 0 : i32
    %2 = arith.minsi %1, %c0_i32 : i32
    %c0_i32_0 = arith.constant 0 : i32
    return %2, %arg1 : i32, i32
  }
  func.func @transform_4(%arg0: i32, %arg1: i32, %arg2: i32) -> (i32, i32, i32) {
    %c0_i32 = arith.constant 0 : i32
    %c0_i32_0 = arith.constant 0 : i32
    return %arg0, %c0_i32, %arg1 : i32, i32, i32
  }
}

</mosaic_0001>

<bundles_post_ra>
// kernel: tpu_custom_call.1
= control target key start
LH: loop header
LB: loop body
LE: loop exit
PB: predicated region body
PF: predicated region fallthrough
CT: control target
= control target key end

     0   :  { %9 = vsyncpa [#allocation3], 0  ;;  %s340_s0 = inlined_call_operand.hbm [shape: s32[1,128], index: 0, kind: input, shape index: {}]   ;;  %s341_s1 = inlined_call_operand.hbm [shape: f32[2,128], index: 1, kind: input, shape index: {}]   ;;  %s342_s2 = inlined_call_operand.hbm [shape: f32[4,128], index: 2, kind: input, shape index: {}]   ;;  %s343_s3 = inlined_call_operand.vmem [shape: f32[4,128], index: 3, kind: input, shape index: {}]   ;;  %s344_s4 = inlined_call_operand.hbm [shape: f32[1,4,128], index: 4, kind: output, shape index: {}]  }
   0x1   :  { %10 = vsyncpa [#allocation6], 0 }
   0x2   :  { %11 = vsyncpa [#allocation4], 0  ;;  %s294_s15 = smov [#allocation5]   ;;  %s295_s17 = smov [#allocation2]  }
   0x3   :  { %s28_s16 = sshll.u32 %s294_s15, 4  ;;  %s18_s18 = sshll.u32 %s295_s17, 4  ;;  %s29_s16 = int_to_ptr.vmem [resolvable:$true] %s28_s16  ;;  %s19_s18 = int_to_ptr.vmem [resolvable:$true] %s18_s18 }
   0x4   :  { %s216_s19 = scalar_lea.vmem %s29_s16, 32  ;;  %p221_p1 = scmp.lt.s32.totalorder %s29_s16, %s29_s16 }
   0x5   :  { %p217_p0 = scmp.ne.s32.totalorder %s29_s16, %s216_s19  ;;  %p222_p2 = scmp.lt.s32.totalorder %s216_s19, %s216_s19 }
   0x7   :  { %p223_p3 = por %p222_p2, %p221_p1 }
   0x9   :  { %p224_p4 = pnand %p223_p3, %p217_p0 }
   0xb   :  { %227 = shalt.err (!%p224_p4)
}
   0xc   :  { %31 = dma.hbm_to_vmem [thread:$0]  %s341_s1, 32, %s29_s16, [#allocation6]  }
   0xd   :  { %s236_s22 = scalar_lea.vmem %s19_s18, 16  ;;  %s240_s23 = scalar_lea.vmem %s19_s18, 32 }
   0xe   :  { %p237_p5 = scmp.ne.s32.totalorder %s19_s18, %s236_s22  ;;  %p241_p6 = scmp.lt.s32.totalorder %s19_s18, %s19_s18 }
   0xf   :  { %p242_p7 = scmp.lt.s32.totalorder %s240_s23, %s236_s22 }
  0x11   :  { %p243_p8 = por %p242_p7, %p241_p6 }
  0x13   :  { %p244_p9 = pnand %p243_p8, %p237_p5 }
  0x15   :  { %247 = shalt.err (!%p244_p9)
}
  0x16   :  { %21 = dma.hbm_to_vmem [thread:$0]  %s340_s0, 16, %s19_s18, [#allocation3]  }
  0x17   :  { %s296_s26 = smov [#allocation7]  }
  0x18   :  { %s43_s27 = sshll.u32 %s296_s26, 4  ;;  %s44_s27 = int_to_ptr.vmem [resolvable:$true] %s43_s27 }
  0x19   :  { %s256_s28 = scalar_lea.vmem %s44_s27, 64  ;;  %p261_p11 = scmp.lt.s32.totalorder %s44_s27, %s44_s27 }
  0x1a   :  { %p257_p10 = scmp.ne.s32.totalorder %s44_s27, %s256_s28  ;;  %p262_p12 = scmp.lt.s32.totalorder %s256_s28, %s256_s28 }
  0x1c   :  { %p263_p13 = por %p262_p12, %p261_p11 }
  0x1e   :  { %p264_p0 = pnand %p263_p13, %p257_p10 }
  0x20   :  { %267 = shalt.err (!%p264_p0)
}
  0x21   :  { %46 = dma.hbm_to_vmem [thread:$0]  %s342_s2, 64, %s44_s27, [#allocation6]  }
  0x22   :  { %288 = dma.done.wait [#allocation3], 16  }
  0x23   :  { %289 = vsyncadd [#allocation3], 4294967280 }
  0x24   :  { %290 = dma.done.wait [#allocation6], 96  }
  0x25   :  { %291 = vsyncadd [#allocation6], 4294967200  ;;  %v97_v0 = vlaneseq  ;;  %v297_v1 = vmov 0.0   ;;  %v199_v4 = vld [vmem:[#allocation2] ss:$0 sm:$0xff]  ;;  %vm298_vm1 = vmmov 1  }
  0x26   :  { %94 = vst [vmem:[#allocation8] sm:$0xf] %v297_v1  ;;  %v200_v5 = vld [vmem:[#allocation5] ss:$0 sm:$0xff]  ;;  %v105_v6 = vld [vmem:[#allocation7] sm:$0xf] }
  0x27   :  { %v98_v2 = vshrl.u32 %v97_v0, 7  ;;  %v106_v8 = vld [vmem:[%s343_s3] sm:$0xf]  ;;  %vm114_vm0 = vcmp.ne.f32.partialorder %v105_v6, %v105_v6  ;;  %v121_v9 = vsub.f32 %v105_v6, %v200_v5  ;;  %vm130_vm6 = vcmask 1043456   ;;  %s299_s2 = smov [#allocation8]  }
  0x28   :  { %vm115_vm2 = vmxor %vm114_vm0, %vm298_vm1  ;;  %v122_v10 = vsub.f32 %v106_v8, %v105_v6  ;;  %s181_s3 = sshll.u32 %s299_s2, 4  ;;  %s182_s3 = int_to_ptr.vmem [resolvable:$true] %s181_s3 }
  0x29   :  { %v99_v3 = vmul.u32 16, %v98_v2  ;;  %v126_v11 = vmul.f32 %v121_v9, %v121_v9  ;;  %s268_s5 = scalar_lea.vmem %s182_s3, 64  ;;  %p273_p2 = scmp.lt.s32.totalorder %s182_s3, %s182_s3 }
  0x2a   :  { %v128_v12 = vmul.f32 %v122_v10, %v122_v10  ;;  %p269_p1 = scmp.ne.s32.totalorder %s182_s3, %s268_s5  ;;  %p274_p3 = scmp.lt.s32.totalorder %s268_s5, %s268_s5 }
  0x2b   :  { %v104_v7 = vadd.s32 %v199_v4, %v99_v3 }
  0x2c   :  { %p275_p4 = por %p274_p3, %p273_p2 }
  0x2d   :  { %vm111_vm3 = vcmp.ge.s32.totalorder %v104_v7, 8  ;;  %vm112_vm4 = vcmp.lt.s32.totalorder %v104_v7, 64  ;;  %v163_v38 = vld [vmem:[#allocation8] sm:$0x1]  ;;  %v166_v42 = vld [vmem:[#allocation8 + $0x1] sm:$0x1] }
  0x2e   :  { %vm113_vm5 = vmand %vm111_vm3, %vm112_vm4  ;;  %v169_v43 = vld [vmem:[#allocation8 + $0x2] sm:$0x1]  ;;  %v172_v44 = vld [vmem:[#allocation8 + $0x3] sm:$0x1]  ;;  %p276_p5 = pnand %p275_p4, %p269_p1 }
  0x2f   :  { %vm116_vm7 = vmand %vm113_vm5, %vm115_vm2 }
  0x30   :  { %v201_v13 = vsel %vm116_vm7, 1.0, %v297_v1  ;;  %v125_v14 = vsel %vm116_vm7, %v121_v9, 0.0  ;;  %v127_v15 = vsel %vm116_vm7, %v126_v11, 0.0  ;;  %v129_v16 = vsel %vm116_vm7, %v128_v12, 0.0 }
  0x31   :  { %v131_v17 = vsel %vm130_vm6, %v201_v13, 0.0  ;;  %v139_v18 = vsel %vm130_vm6, %v125_v14, 0.0  ;;  %v147_v19 = vsel %vm130_vm6, %v127_v15, 0.0  ;;  %v155_v20 = vsel %vm130_vm6, %v129_v16, 0.0 }
  0x32   :  { %v132_v21 = vrot.slane %v131_v17, 4  ;;  %v140_v22 = vrot.slane %v139_v18, 4  ;;  %v148_v23 = vrot.slane %v147_v19, 4  ;;  %v156_v24 = vrot.slane %v155_v20, 4 }
  0x34   :  { %v133_v25 = vadd.f32 %v132_v21, %v131_v17  ;;  %v141_v26 = vadd.f32 %v140_v22, %v139_v18  ;;  %v149_v27 = vadd.f32 %v148_v23, %v147_v19  ;;  %v157_v28 = vadd.f32 %v156_v24, %v155_v20 }
  0x36   :  { %v134_v29 = vrot.slane %v133_v25, 2  ;;  %v142_v30 = vrot.slane %v141_v26, 2  ;;  %v150_v31 = vrot.slane %v149_v27, 2  ;;  %v158_v32 = vrot.slane %v157_v28, 2 }
  0x38   :  { %v135_v33 = vadd.f32 %v134_v29, %v133_v25  ;;  %v143_v34 = vadd.f32 %v142_v30, %v141_v26  ;;  %v151_v35 = vadd.f32 %v150_v31, %v149_v27  ;;  %v159_v36 = vadd.f32 %v158_v32, %v157_v28 }
  0x3a   :  { %v136_v37 = vrot.slane %v135_v33, 1  ;;  %v144_v39 = vrot.slane %v143_v34, 1  ;;  %v152_v40 = vrot.slane %v151_v35, 1  ;;  %v160_v41 = vrot.slane %v159_v36, 1 }
  0x3c   :  { %v137_v45 = vadd.f32 %v136_v37, %v135_v33  ;;  %v145_v46 = vadd.f32 %v144_v39, %v143_v34  ;;  %v153_v47 = vadd.f32 %v152_v40, %v151_v35  ;;  %v161_v48 = vadd.f32 %v160_v41, %v159_v36 }
  0x3e   :  { %v164_v49 = vadd.f32 %v163_v38, %v137_v45  ;;  %v167_v50 = vadd.f32 %v166_v42, %v145_v46  ;;  %v170_v51 = vadd.f32 %v169_v43, %v153_v47  ;;  %v173_v52 = vadd.f32 %v172_v44, %v161_v48 }
  0x40   :  { %165 = vst [vmem:[#allocation8] sm:$0x1] %v164_v49  ;;  %168 = vst [vmem:[#allocation8 + $0x1] sm:$0x1] %v167_v50 }
  0x41   :  { %171 = vst [vmem:[#allocation8 + $0x2] sm:$0x1] %v170_v51  ;;  %174 = vst [vmem:[#allocation8 + $0x3] sm:$0x1] %v173_v52 }
  0x42   :  { %279 = shalt.err (!%p276_p5)
}
  0x43   :  { %184 = dma.vmem_to_hbm [thread:$0]  %s182_s3, 64, %s344_s4, [#allocation4]  }
  0x44   :  { %292 = dma.done.wait [#allocation4], 64  }
  0x45   :  { %293 = vsyncadd [#allocation4], 4294967232 }
  0x46   :  { %188 = vsyncpa [#allocation3], 1 }
  0x47   :  { %189 = vsyncpa [#allocation6], 1 }
  0x48   :  { %190 = vsyncpa [#allocation4], 1 }

</bundles_post_ra>
